<compile_context>
chip_gen: v5e
topology: v5e:2x2
jax: 0.10.0
libtpu: 0.0.40
codegen_flags: <defaults>
</compile_context>

<pallas_src>
import functools

import jax
import jax.numpy as jnp
from jax.experimental import pallas as pl
from jax.experimental.pallas import tpu as pltpu

NEG_SLOPE = 0.01                                   # nn.LeakyReLU() default
LAYER_DIMS = ((2, 8), (8, 16), (16, 8), (8, 1))    # (in, out) per layer
_PACK_ROWS = 16                                    # max out dim
_PACK_COLS = 128                                   # lane-aligned packed width
_N_COLS_USED = sum(i + 1 for i, _ in LAYER_DIMS)   # 38 (weights + bias per layer)


def _round_up(x, m):
    return ((x + m - 1) // m) * m


def _layer(P, h, n_in, n_out, c0, activate):
    """y = W @ h + b as VPU broadcast FMAs.

    P:  (16, 128) packed params; weight col i of this layer is P[:n_out, c0+i],
        bias is P[:n_out, c0+n_in].
    h:  (n_in, T) activations (batch on lanes).
    """
    acc = P[0:n_out, c0:c0 + 1] * h[0:1, :]                      # (n_out, T)
    for i in range(1, n_in):
        acc = acc + P[0:n_out, c0 + i:c0 + i + 1] * h[i:i + 1, :]
    acc = acc + P[0:n_out, c0 + n_in:c0 + n_in + 1]              # bias
    if activate:
        acc = jnp.where(acc > 0, acc, NEG_SLOPE * acc)           # LeakyReLU
    return acc


def mynn_kernel(p_ref, x_ref, o_ref):
    P = p_ref[...]          # (16, 128) packed weights/biases
    h = x_ref[...]          # (2, T) float32, batch on lanes
    col = 0
    last = len(LAYER_DIMS) - 1
    for li, (n_in, n_out) in enumerate(LAYER_DIMS):
        h = _layer(P, h, n_in, n_out, col, activate=(li < last))
        col += n_in + 1
    o_ref[...] = h.astype(o_ref.dtype)   # (1, T), lane-dense store


def pack_params(params):
    """Pack per-layer (out,in) weights and (out,) biases into one (16,128) array."""
    P = jnp.zeros((_PACK_ROWS, _PACK_COLS), jnp.float32)
    col = 0
    for idx, (fan_in, fan_out) in enumerate(LAYER_DIMS, start=1):
        w = params[f"w{idx}"]          # (out, in) -- PyTorch Linear convention
        b = params[f"b{idx}"]          # (out,)
        P = P.at[:fan_out, col:col + fan_in].set(w)
        P = P.at[:fan_out, col + fan_in].set(b)
        col += fan_in + 1
    assert col == _N_COLS_USED
    return P


@functools.partial(jax.jit, static_argnames=("batch_tile",))
def mynn_forward(x, packed_params, *, batch_tile=1024):
    """x: (B, 2) float32 (PyTorch layout). Returns (B, 1) float32."""
    B, in_dim = x.shape
    assert in_dim == 2

    # Lane-dense tile: multiple of 128.  For large B the default 1024-row tile
    # keeps the grid >= 2 steps so the "parallel" axis can shard across v7x's
    # two TensorCores while still amortising the ~0.35 us per-step overhead.
    tile = min(_round_up(batch_tile, 128), _round_up(B, 128))
    Bp = _round_up(B, tile)

    # Transpose to (features, batch) and pad the batch (lane) axis.
    xT = jnp.pad(x.astype(jnp.float32).T, ((0, 0), (0, Bp - B)))

    flops_per_row = 2 * sum(i * o for i, o in LAYER_DIMS)   # 608
    out = pl.pallas_call(
        mynn_kernel,
        out_shape=jax.ShapeDtypeStruct((1, Bp), jnp.float32),
        grid=(Bp // tile,),
        in_specs=[
            pl.BlockSpec((_PACK_ROWS, _PACK_COLS), lambda i: (0, 0)),  # packed params
            pl.BlockSpec((2, tile), lambda i: (0, i)),                 # x tile
        ],
        out_specs=pl.BlockSpec((1, tile), lambda i: (0, i)),           # lane-dense out
        compiler_params=pltpu.CompilerParams(
            dimension_semantics=("parallel",)),
        cost_estimate=pl.CostEstimate(
            flops=flops_per_row * Bp,
            transcendentals=0,
            bytes_accessed=(2 + 1) * 4 * Bp + _PACK_ROWS * _PACK_COLS * 4),
    )(packed_params, xT)

    return out[:, :B].T   # (B, 1)


def init_params(key):
    """PyTorch Linear default init: U(-1/sqrt(fan_in), +1/sqrt(fan_in))."""
    params = {}
    for idx, (fan_in, fan_out) in enumerate(LAYER_DIMS, start=1):
        key, kw, kb = jax.random.split(key, 3)
        bound = 1.0 / jnp.sqrt(float(fan_in))
        # weight stored as (out, in), matching torch.nn.Linear.weight
        params[f"w{idx}"] = jax.random.uniform(
            kw, (fan_out, fan_in), jnp.float32, minval=-bound, maxval=bound)
        params[f"b{idx}"] = jax.random.uniform(
            kb, (fan_out,), jnp.float32, minval=-bound, maxval=bound)
    return params


def reference_forward(x, params):
    h = x
    last = len(LAYER_DIMS)
    for idx in range(1, last + 1):
        h = h @ params[f"w{idx}"].T + params[f"b{idx}"]
        if idx < last:
            h = jnp.where(h > 0, h, NEG_SLOPE * h)
    return h


if __name__ == "__main__":
    key = jax.random.PRNGKey(0)
    key, kx = jax.random.split(key)

    B = 300   # small, deliberately not a multiple of 128 to exercise padding
    x = jax.random.normal(kx, (B, 2), dtype=jnp.float32)

    params = init_params(key)
    packed = pack_params(params)

    out = mynn_forward(x, packed)
    out = jax.block_until_ready(out)

    ref = reference_forward(x, params)
    assert out.shape == (B, 1)
    assert jnp.allclose(out, ref, atol=1e-5, rtol=1e-5), "mismatch vs pure-JAX reference"

    print("KERNEL_OK")
</pallas_src>

<mosaic_0001>
module attributes {stable_mosaic.version = 11 : i64} {
  func.func @mynn_kernel(%arg0: i32, %arg1: memref<16x128xf32, #tpu.memory_space<vmem>>, %arg2: memref<2x384xf32, #tpu.memory_space<vmem>>, %arg3: memref<1x384xf32, #tpu.memory_space<vmem>>) attributes {dimension_semantics = [#tpu.dimension_semantics<parallel>], iteration_bounds = array<i64: 1>, scalar_prefetch = 0 : i64, scratch_operands = 0 : i64, tpu.core_type = #tpu.core_type<tc>, window_params = [{pipeline_mode = #tpu.pipeline_mode<synchronous>, transform_indices = @transform_0, window_bounds = array<i64: 16, 128>}, {transform_indices = @transform_1, window_bounds = array<i64: 2, 384>}, {transform_indices = @transform_2, window_bounds = array<i64: 1, 384>}]} {
    %c0 = arith.constant 0 : index
    %c0_0 = arith.constant 0 : index
    %0 = vector.load %arg1[%c0, %c0_0] : memref<16x128xf32, #tpu.memory_space<vmem>>, vector<16x128xf32>
    %c0_1 = arith.constant 0 : index
    %c0_2 = arith.constant 0 : index
    %1 = vector.load %arg2[%c0_1, %c0_2] : memref<2x384xf32, #tpu.memory_space<vmem>>, vector<2x384xf32>
    %2 = vector.extract_strided_slice %0 {offsets = [0, 0], sizes = [8, 1], strides = [1, 1]} : vector<16x128xf32> to vector<8x1xf32>
    %3 = vector.extract_strided_slice %1 {offsets = [0, 0], sizes = [1, 384], strides = [1, 1]} : vector<2x384xf32> to vector<1x384xf32>
    %4 = vector.broadcast %2 : vector<8x1xf32> to vector<8x384xf32>
    %5 = vector.broadcast %3 : vector<1x384xf32> to vector<8x384xf32>
    %6 = arith.mulf %4, %5 : vector<8x384xf32>
    %7 = vector.extract_strided_slice %0 {offsets = [0, 1], sizes = [8, 1], strides = [1, 1]} : vector<16x128xf32> to vector<8x1xf32>
    %8 = vector.extract_strided_slice %1 {offsets = [1, 0], sizes = [1, 384], strides = [1, 1]} : vector<2x384xf32> to vector<1x384xf32>
    %9 = vector.broadcast %7 : vector<8x1xf32> to vector<8x384xf32>
    %10 = vector.broadcast %8 : vector<1x384xf32> to vector<8x384xf32>
    %11 = arith.mulf %9, %10 : vector<8x384xf32>
    %12 = arith.addf %6, %11 : vector<8x384xf32>
    %13 = vector.extract_strided_slice %0 {offsets = [0, 2], sizes = [8, 1], strides = [1, 1]} : vector<16x128xf32> to vector<8x1xf32>
    %14 = vector.broadcast %13 : vector<8x1xf32> to vector<8x384xf32>
    %15 = arith.addf %12, %14 : vector<8x384xf32>
    %cst = arith.constant 0.000000e+00 : f32
    %16 = vector.broadcast %cst : f32 to vector<8x384xf32>
    %17 = arith.cmpf ogt, %15, %16 : vector<8x384xf32>
    %cst_3 = arith.constant 0.00999999977 : f32
    %18 = vector.broadcast %cst_3 : f32 to vector<8x384xf32>
    %19 = arith.mulf %18, %15 : vector<8x384xf32>
    %20 = arith.select %17, %15, %19 : vector<8x384xi1>, vector<8x384xf32>
    %21 = vector.extract_strided_slice %0 {offsets = [0, 3], sizes = [16, 1], strides = [1, 1]} : vector<16x128xf32> to vector<16x1xf32>
    %22 = vector.extract_strided_slice %20 {offsets = [0, 0], sizes = [1, 384], strides = [1, 1]} : vector<8x384xf32> to vector<1x384xf32>
    %23 = vector.broadcast %21 : vector<16x1xf32> to vector<16x384xf32>
    %24 = vector.broadcast %22 : vector<1x384xf32> to vector<16x384xf32>
    %25 = arith.mulf %23, %24 : vector<16x384xf32>
    %26 = vector.extract_strided_slice %0 {offsets = [0, 4], sizes = [16, 1], strides = [1, 1]} : vector<16x128xf32> to vector<16x1xf32>
    %27 = vector.extract_strided_slice %20 {offsets = [1, 0], sizes = [1, 384], strides = [1, 1]} : vector<8x384xf32> to vector<1x384xf32>
    %28 = vector.broadcast %26 : vector<16x1xf32> to vector<16x384xf32>
    %29 = vector.broadcast %27 : vector<1x384xf32> to vector<16x384xf32>
    %30 = arith.mulf %28, %29 : vector<16x384xf32>
    %31 = arith.addf %25, %30 : vector<16x384xf32>
    %32 = vector.extract_strided_slice %0 {offsets = [0, 5], sizes = [16, 1], strides = [1, 1]} : vector<16x128xf32> to vector<16x1xf32>
    %33 = vector.extract_strided_slice %20 {offsets = [2, 0], sizes = [1, 384], strides = [1, 1]} : vector<8x384xf32> to vector<1x384xf32>
    %34 = vector.broadcast %32 : vector<16x1xf32> to vector<16x384xf32>
    %35 = vector.broadcast %33 : vector<1x384xf32> to vector<16x384xf32>
    %36 = arith.mulf %34, %35 : vector<16x384xf32>
    %37 = arith.addf %31, %36 : vector<16x384xf32>
    %38 = vector.extract_strided_slice %0 {offsets = [0, 6], sizes = [16, 1], strides = [1, 1]} : vector<16x128xf32> to vector<16x1xf32>
    %39 = vector.extract_strided_slice %20 {offsets = [3, 0], sizes = [1, 384], strides = [1, 1]} : vector<8x384xf32> to vector<1x384xf32>
    %40 = vector.broadcast %38 : vector<16x1xf32> to vector<16x384xf32>
    %41 = vector.broadcast %39 : vector<1x384xf32> to vector<16x384xf32>
    %42 = arith.mulf %40, %41 : vector<16x384xf32>
    %43 = arith.addf %37, %42 : vector<16x384xf32>
    %44 = vector.extract_strided_slice %0 {offsets = [0, 7], sizes = [16, 1], strides = [1, 1]} : vector<16x128xf32> to vector<16x1xf32>
    %45 = vector.extract_strided_slice %20 {offsets = [4, 0], sizes = [1, 384], strides = [1, 1]} : vector<8x384xf32> to vector<1x384xf32>
    %46 = vector.broadcast %44 : vector<16x1xf32> to vector<16x384xf32>
    %47 = vector.broadcast %45 : vector<1x384xf32> to vector<16x384xf32>
    %48 = arith.mulf %46, %47 : vector<16x384xf32>
    %49 = arith.addf %43, %48 : vector<16x384xf32>
    %50 = vector.extract_strided_slice %0 {offsets = [0, 8], sizes = [16, 1], strides = [1, 1]} : vector<16x128xf32> to vector<16x1xf32>
    %51 = vector.extract_strided_slice %20 {offsets = [5, 0], sizes = [1, 384], strides = [1, 1]} : vector<8x384xf32> to vector<1x384xf32>
    %52 = vector.broadcast %50 : vector<16x1xf32> to vector<16x384xf32>
    %53 = vector.broadcast %51 : vector<1x384xf32> to vector<16x384xf32>
    %54 = arith.mulf %52, %53 : vector<16x384xf32>
    %55 = arith.addf %49, %54 : vector<16x384xf32>
    %56 = vector.extract_strided_slice %0 {offsets = [0, 9], sizes = [16, 1], strides = [1, 1]} : vector<16x128xf32> to vector<16x1xf32>
    %57 = vector.extract_strided_slice %20 {offsets = [6, 0], sizes = [1, 384], strides = [1, 1]} : vector<8x384xf32> to vector<1x384xf32>
    %58 = vector.broadcast %56 : vector<16x1xf32> to vector<16x384xf32>
    %59 = vector.broadcast %57 : vector<1x384xf32> to vector<16x384xf32>
    %60 = arith.mulf %58, %59 : vector<16x384xf32>
    %61 = arith.addf %55, %60 : vector<16x384xf32>
    %62 = vector.extract_strided_slice %0 {offsets = [0, 10], sizes = [16, 1], strides = [1, 1]} : vector<16x128xf32> to vector<16x1xf32>
    %63 = vector.extract_strided_slice %20 {offsets = [7, 0], sizes = [1, 384], strides = [1, 1]} : vector<8x384xf32> to vector<1x384xf32>
    %64 = vector.broadcast %62 : vector<16x1xf32> to vector<16x384xf32>
    %65 = vector.broadcast %63 : vector<1x384xf32> to vector<16x384xf32>
    %66 = arith.mulf %64, %65 : vector<16x384xf32>
    %67 = arith.addf %61, %66 : vector<16x384xf32>
    %68 = vector.extract_strided_slice %0 {offsets = [0, 11], sizes = [16, 1], strides = [1, 1]} : vector<16x128xf32> to vector<16x1xf32>
    %69 = vector.broadcast %68 : vector<16x1xf32> to vector<16x384xf32>
    %70 = arith.addf %67, %69 : vector<16x384xf32>
    %cst_4 = arith.constant 0.000000e+00 : f32
    %71 = vector.broadcast %cst_4 : f32 to vector<16x384xf32>
    %72 = arith.cmpf ogt, %70, %71 : vector<16x384xf32>
    %cst_5 = arith.constant 0.00999999977 : f32
    %73 = vector.broadcast %cst_5 : f32 to vector<16x384xf32>
    %74 = arith.mulf %73, %70 : vector<16x384xf32>
    %75 = arith.select %72, %70, %74 : vector<16x384xi1>, vector<16x384xf32>
    %76 = vector.extract_strided_slice %0 {offsets = [0, 12], sizes = [8, 1], strides = [1, 1]} : vector<16x128xf32> to vector<8x1xf32>
    %77 = vector.extract_strided_slice %75 {offsets = [0, 0], sizes = [1, 384], strides = [1, 1]} : vector<16x384xf32> to vector<1x384xf32>
    %78 = vector.broadcast %76 : vector<8x1xf32> to vector<8x384xf32>
    %79 = vector.broadcast %77 : vector<1x384xf32> to vector<8x384xf32>
    %80 = arith.mulf %78, %79 : vector<8x384xf32>
    %81 = vector.extract_strided_slice %0 {offsets = [0, 13], sizes = [8, 1], strides = [1, 1]} : vector<16x128xf32> to vector<8x1xf32>
    %82 = vector.extract_strided_slice %75 {offsets = [1, 0], sizes = [1, 384], strides = [1, 1]} : vector<16x384xf32> to vector<1x384xf32>
    %83 = vector.broadcast %81 : vector<8x1xf32> to vector<8x384xf32>
    %84 = vector.broadcast %82 : vector<1x384xf32> to vector<8x384xf32>
    %85 = arith.mulf %83, %84 : vector<8x384xf32>
    %86 = arith.addf %80, %85 : vector<8x384xf32>
    %87 = vector.extract_strided_slice %0 {offsets = [0, 14], sizes = [8, 1], strides = [1, 1]} : vector<16x128xf32> to vector<8x1xf32>
    %88 = vector.extract_strided_slice %75 {offsets = [2, 0], sizes = [1, 384], strides = [1, 1]} : vector<16x384xf32> to vector<1x384xf32>
    %89 = vector.broadcast %87 : vector<8x1xf32> to vector<8x384xf32>
    %90 = vector.broadcast %88 : vector<1x384xf32> to vector<8x384xf32>
    %91 = arith.mulf %89, %90 : vector<8x384xf32>
    %92 = arith.addf %86, %91 : vector<8x384xf32>
    %93 = vector.extract_strided_slice %0 {offsets = [0, 15], sizes = [8, 1], strides = [1, 1]} : vector<16x128xf32> to vector<8x1xf32>
    %94 = vector.extract_strided_slice %75 {offsets = [3, 0], sizes = [1, 384], strides = [1, 1]} : vector<16x384xf32> to vector<1x384xf32>
    %95 = vector.broadcast %93 : vector<8x1xf32> to vector<8x384xf32>
    %96 = vector.broadcast %94 : vector<1x384xf32> to vector<8x384xf32>
    %97 = arith.mulf %95, %96 : vector<8x384xf32>
    %98 = arith.addf %92, %97 : vector<8x384xf32>
    %99 = vector.extract_strided_slice %0 {offsets = [0, 16], sizes = [8, 1], strides = [1, 1]} : vector<16x128xf32> to vector<8x1xf32>
    %100 = vector.extract_strided_slice %75 {offsets = [4, 0], sizes = [1, 384], strides = [1, 1]} : vector<16x384xf32> to vector<1x384xf32>
    %101 = vector.broadcast %99 : vector<8x1xf32> to vector<8x384xf32>
    %102 = vector.broadcast %100 : vector<1x384xf32> to vector<8x384xf32>
    %103 = arith.mulf %101, %102 : vector<8x384xf32>
    %104 = arith.addf %98, %103 : vector<8x384xf32>
    %105 = vector.extract_strided_slice %0 {offsets = [0, 17], sizes = [8, 1], strides = [1, 1]} : vector<16x128xf32> to vector<8x1xf32>
    %106 = vector.extract_strided_slice %75 {offsets = [5, 0], sizes = [1, 384], strides = [1, 1]} : vector<16x384xf32> to vector<1x384xf32>
    %107 = vector.broadcast %105 : vector<8x1xf32> to vector<8x384xf32>
    %108 = vector.broadcast %106 : vector<1x384xf32> to vector<8x384xf32>
    %109 = arith.mulf %107, %108 : vector<8x384xf32>
    %110 = arith.addf %104, %109 : vector<8x384xf32>
    %111 = vector.extract_strided_slice %0 {offsets = [0, 18], sizes = [8, 1], strides = [1, 1]} : vector<16x128xf32> to vector<8x1xf32>
    %112 = vector.extract_strided_slice %75 {offsets = [6, 0], sizes = [1, 384], strides = [1, 1]} : vector<16x384xf32> to vector<1x384xf32>
    %113 = vector.broadcast %111 : vector<8x1xf32> to vector<8x384xf32>
    %114 = vector.broadcast %112 : vector<1x384xf32> to vector<8x384xf32>
    %115 = arith.mulf %113, %114 : vector<8x384xf32>
    %116 = arith.addf %110, %115 : vector<8x384xf32>
    %117 = vector.extract_strided_slice %0 {offsets = [0, 19], sizes = [8, 1], strides = [1, 1]} : vector<16x128xf32> to vector<8x1xf32>
    %118 = vector.extract_strided_slice %75 {offsets = [7, 0], sizes = [1, 384], strides = [1, 1]} : vector<16x384xf32> to vector<1x384xf32>
    %119 = vector.broadcast %117 : vector<8x1xf32> to vector<8x384xf32>
    %120 = vector.broadcast %118 : vector<1x384xf32> to vector<8x384xf32>
    %121 = arith.mulf %119, %120 : vector<8x384xf32>
    %122 = arith.addf %116, %121 : vector<8x384xf32>
    %123 = vector.extract_strided_slice %0 {offsets = [0, 20], sizes = [8, 1], strides = [1, 1]} : vector<16x128xf32> to vector<8x1xf32>
    %124 = vector.extract_strided_slice %75 {offsets = [8, 0], sizes = [1, 384], strides = [1, 1]} : vector<16x384xf32> to vector<1x384xf32>
    %125 = vector.broadcast %123 : vector<8x1xf32> to vector<8x384xf32>
    %126 = vector.broadcast %124 : vector<1x384xf32> to vector<8x384xf32>
    %127 = arith.mulf %125, %126 : vector<8x384xf32>
    %128 = arith.addf %122, %127 : vector<8x384xf32>
    %129 = vector.extract_strided_slice %0 {offsets = [0, 21], sizes = [8, 1], strides = [1, 1]} : vector<16x128xf32> to vector<8x1xf32>
    %130 = vector.extract_strided_slice %75 {offsets = [9, 0], sizes = [1, 384], strides = [1, 1]} : vector<16x384xf32> to vector<1x384xf32>
    %131 = vector.broadcast %129 : vector<8x1xf32> to vector<8x384xf32>
    %132 = vector.broadcast %130 : vector<1x384xf32> to vector<8x384xf32>
    %133 = arith.mulf %131, %132 : vector<8x384xf32>
    %134 = arith.addf %128, %133 : vector<8x384xf32>
    %135 = vector.extract_strided_slice %0 {offsets = [0, 22], sizes = [8, 1], strides = [1, 1]} : vector<16x128xf32> to vector<8x1xf32>
    %136 = vector.extract_strided_slice %75 {offsets = [10, 0], sizes = [1, 384], strides = [1, 1]} : vector<16x384xf32> to vector<1x384xf32>
    %137 = vector.broadcast %135 : vector<8x1xf32> to vector<8x384xf32>
    %138 = vector.broadcast %136 : vector<1x384xf32> to vector<8x384xf32>
    %139 = arith.mulf %137, %138 : vector<8x384xf32>
    %140 = arith.addf %134, %139 : vector<8x384xf32>
    %141 = vector.extract_strided_slice %0 {offsets = [0, 23], sizes = [8, 1], strides = [1, 1]} : vector<16x128xf32> to vector<8x1xf32>
    %142 = vector.extract_strided_slice %75 {offsets = [11, 0], sizes = [1, 384], strides = [1, 1]} : vector<16x384xf32> to vector<1x384xf32>
    %143 = vector.broadcast %141 : vector<8x1xf32> to vector<8x384xf32>
    %144 = vector.broadcast %142 : vector<1x384xf32> to vector<8x384xf32>
    %145 = arith.mulf %143, %144 : vector<8x384xf32>
    %146 = arith.addf %140, %145 : vector<8x384xf32>
    %147 = vector.extract_strided_slice %0 {offsets = [0, 24], sizes = [8, 1], strides = [1, 1]} : vector<16x128xf32> to vector<8x1xf32>
    %148 = vector.extract_strided_slice %75 {offsets = [12, 0], sizes = [1, 384], strides = [1, 1]} : vector<16x384xf32> to vector<1x384xf32>
    %149 = vector.broadcast %147 : vector<8x1xf32> to vector<8x384xf32>
    %150 = vector.broadcast %148 : vector<1x384xf32> to vector<8x384xf32>
    %151 = arith.mulf %149, %150 : vector<8x384xf32>
    %152 = arith.addf %146, %151 : vector<8x384xf32>
    %153 = vector.extract_strided_slice %0 {offsets = [0, 25], sizes = [8, 1], strides = [1, 1]} : vector<16x128xf32> to vector<8x1xf32>
    %154 = vector.extract_strided_slice %75 {offsets = [13, 0], sizes = [1, 384], strides = [1, 1]} : vector<16x384xf32> to vector<1x384xf32>
    %155 = vector.broadcast %153 : vector<8x1xf32> to vector<8x384xf32>
    %156 = vector.broadcast %154 : vector<1x384xf32> to vector<8x384xf32>
    %157 = arith.mulf %155, %156 : vector<8x384xf32>
    %158 = arith.addf %152, %157 : vector<8x384xf32>
    %159 = vector.extract_strided_slice %0 {offsets = [0, 26], sizes = [8, 1], strides = [1, 1]} : vector<16x128xf32> to vector<8x1xf32>
    %160 = vector.extract_strided_slice %75 {offsets = [14, 0], sizes = [1, 384], strides = [1, 1]} : vector<16x384xf32> to vector<1x384xf32>
    %161 = vector.broadcast %159 : vector<8x1xf32> to vector<8x384xf32>
    %162 = vector.broadcast %160 : vector<1x384xf32> to vector<8x384xf32>
    %163 = arith.mulf %161, %162 : vector<8x384xf32>
    %164 = arith.addf %158, %163 : vector<8x384xf32>
    %165 = vector.extract_strided_slice %0 {offsets = [0, 27], sizes = [8, 1], strides = [1, 1]} : vector<16x128xf32> to vector<8x1xf32>
    %166 = vector.extract_strided_slice %75 {offsets = [15, 0], sizes = [1, 384], strides = [1, 1]} : vector<16x384xf32> to vector<1x384xf32>
    %167 = vector.broadcast %165 : vector<8x1xf32> to vector<8x384xf32>
    %168 = vector.broadcast %166 : vector<1x384xf32> to vector<8x384xf32>
    %169 = arith.mulf %167, %168 : vector<8x384xf32>
    %170 = arith.addf %164, %169 : vector<8x384xf32>
    %171 = vector.extract_strided_slice %0 {offsets = [0, 28], sizes = [8, 1], strides = [1, 1]} : vector<16x128xf32> to vector<8x1xf32>
    %172 = vector.broadcast %171 : vector<8x1xf32> to vector<8x384xf32>
    %173 = arith.addf %170, %172 : vector<8x384xf32>
    %cst_6 = arith.constant 0.000000e+00 : f32
    %174 = vector.broadcast %cst_6 : f32 to vector<8x384xf32>
    %175 = arith.cmpf ogt, %173, %174 : vector<8x384xf32>
    %cst_7 = arith.constant 0.00999999977 : f32
    %176 = vector.broadcast %cst_7 : f32 to vector<8x384xf32>
    %177 = arith.mulf %176, %173 : vector<8x384xf32>
    %178 = arith.select %175, %173, %177 : vector<8x384xi1>, vector<8x384xf32>
    %179 = vector.extract_strided_slice %0 {offsets = [0, 29], sizes = [1, 1], strides = [1, 1]} : vector<16x128xf32> to vector<1x1xf32>
    %180 = vector.extract_strided_slice %178 {offsets = [0, 0], sizes = [1, 384], strides = [1, 1]} : vector<8x384xf32> to vector<1x384xf32>
    %181 = vector.broadcast %179 : vector<1x1xf32> to vector<1x384xf32>
    %182 = arith.mulf %181, %180 : vector<1x384xf32>
    %183 = vector.extract_strided_slice %0 {offsets = [0, 30], sizes = [1, 1], strides = [1, 1]} : vector<16x128xf32> to vector<1x1xf32>
    %184 = vector.extract_strided_slice %178 {offsets = [1, 0], sizes = [1, 384], strides = [1, 1]} : vector<8x384xf32> to vector<1x384xf32>
    %185 = vector.broadcast %183 : vector<1x1xf32> to vector<1x384xf32>
    %186 = arith.mulf %185, %184 : vector<1x384xf32>
    %187 = arith.addf %182, %186 : vector<1x384xf32>
    %188 = vector.extract_strided_slice %0 {offsets = [0, 31], sizes = [1, 1], strides = [1, 1]} : vector<16x128xf32> to vector<1x1xf32>
    %189 = vector.extract_strided_slice %178 {offsets = [2, 0], sizes = [1, 384], strides = [1, 1]} : vector<8x384xf32> to vector<1x384xf32>
    %190 = vector.broadcast %188 : vector<1x1xf32> to vector<1x384xf32>
    %191 = arith.mulf %190, %189 : vector<1x384xf32>
    %192 = arith.addf %187, %191 : vector<1x384xf32>
    %193 = vector.extract_strided_slice %0 {offsets = [0, 32], sizes = [1, 1], strides = [1, 1]} : vector<16x128xf32> to vector<1x1xf32>
    %194 = vector.extract_strided_slice %178 {offsets = [3, 0], sizes = [1, 384], strides = [1, 1]} : vector<8x384xf32> to vector<1x384xf32>
    %195 = vector.broadcast %193 : vector<1x1xf32> to vector<1x384xf32>
    %196 = arith.mulf %195, %194 : vector<1x384xf32>
    %197 = arith.addf %192, %196 : vector<1x384xf32>
    %198 = vector.extract_strided_slice %0 {offsets = [0, 33], sizes = [1, 1], strides = [1, 1]} : vector<16x128xf32> to vector<1x1xf32>
    %199 = vector.extract_strided_slice %178 {offsets = [4, 0], sizes = [1, 384], strides = [1, 1]} : vector<8x384xf32> to vector<1x384xf32>
    %200 = vector.broadcast %198 : vector<1x1xf32> to vector<1x384xf32>
    %201 = arith.mulf %200, %199 : vector<1x384xf32>
    %202 = arith.addf %197, %201 : vector<1x384xf32>
    %203 = vector.extract_strided_slice %0 {offsets = [0, 34], sizes = [1, 1], strides = [1, 1]} : vector<16x128xf32> to vector<1x1xf32>
    %204 = vector.extract_strided_slice %178 {offsets = [5, 0], sizes = [1, 384], strides = [1, 1]} : vector<8x384xf32> to vector<1x384xf32>
    %205 = vector.broadcast %203 : vector<1x1xf32> to vector<1x384xf32>
    %206 = arith.mulf %205, %204 : vector<1x384xf32>
    %207 = arith.addf %202, %206 : vector<1x384xf32>
    %208 = vector.extract_strided_slice %0 {offsets = [0, 35], sizes = [1, 1], strides = [1, 1]} : vector<16x128xf32> to vector<1x1xf32>
    %209 = vector.extract_strided_slice %178 {offsets = [6, 0], sizes = [1, 384], strides = [1, 1]} : vector<8x384xf32> to vector<1x384xf32>
    %210 = vector.broadcast %208 : vector<1x1xf32> to vector<1x384xf32>
    %211 = arith.mulf %210, %209 : vector<1x384xf32>
    %212 = arith.addf %207, %211 : vector<1x384xf32>
    %213 = vector.extract_strided_slice %0 {offsets = [0, 36], sizes = [1, 1], strides = [1, 1]} : vector<16x128xf32> to vector<1x1xf32>
    %214 = vector.extract_strided_slice %178 {offsets = [7, 0], sizes = [1, 384], strides = [1, 1]} : vector<8x384xf32> to vector<1x384xf32>
    %215 = vector.broadcast %213 : vector<1x1xf32> to vector<1x384xf32>
    %216 = arith.mulf %215, %214 : vector<1x384xf32>
    %217 = arith.addf %212, %216 : vector<1x384xf32>
    %218 = vector.extract_strided_slice %0 {offsets = [0, 37], sizes = [1, 1], strides = [1, 1]} : vector<16x128xf32> to vector<1x1xf32>
    %219 = vector.broadcast %218 : vector<1x1xf32> to vector<1x384xf32>
    %220 = arith.addf %217, %219 : vector<1x384xf32>
    %c0_8 = arith.constant 0 : index
    %c0_9 = arith.constant 0 : index
    %221 = vector.load %arg3[%c0_8, %c0_9] : memref<1x384xf32, #tpu.memory_space<vmem>>, vector<1x384xf32>
    tpu.vector_store %arg3[%c0_8, %c0_9], %220 {strides = array<i32>} : memref<1x384xf32, #tpu.memory_space<vmem>>, vector<1x384xf32>,
    return
  }
  func.func @transform_0(%arg0: i32) -> (i32, i32) {
    %c0_i32 = arith.constant 0 : i32
    %c0_i32_0 = arith.constant 0 : i32
    %c0_i32_1 = arith.constant 0 : i32
    return %c0_i32, %c0_i32_0 : i32, i32
  }
  func.func @transform_1(%arg0: i32) -> (i32, i32) {
    %c0_i32 = arith.constant 0 : i32
    %c0_i32_0 = arith.constant 0 : i32
    return %c0_i32, %arg0 : i32, i32
  }
  func.func @transform_2(%arg0: i32) -> (i32, i32) {
    %c0_i32 = arith.constant 0 : i32
    %c0_i32_0 = arith.constant 0 : i32
    return %c0_i32, %arg0 : i32, i32
  }
}

</mosaic_0001>

<bundles_post_ra>
// kernel: mynn_forward.1
= control target key start
LH: loop header
LB: loop body
LE: loop exit
PB: predicated region body
PF: predicated region fallthrough
CT: control target
= control target key end

     0   :  { %7 = vsyncpa [#allocation3], 0  ;;  %s779_s12 = smov [#allocation2]   ;;  %s780_s14 = smov 128   ;;  %s1102_s0 = inlined_call_operand.hbm [shape: f32[16,128], index: 0, kind: input, shape index: {}]   ;;  %s1103_s1 = inlined_call_operand.vmem [shape: f32[2,384], index: 1, kind: input, shape index: {}]   ;;  %s1104_s2 = inlined_call_operand.vmem [shape: f32[1,384], index: 2, kind: output, shape index: {}]  }
   0x1   :  { %s12_s11 = sshll.u32 %s1102_s0, 4  ;;  %s14_s13 = sshll.u32 %s779_s12, 4  ;;  %s13_s11 = int_to_ptr.hbm [resolvable:$true] %s12_s11  ;;  %s15_s13 = int_to_ptr.vmem [resolvable:$true] %s14_s13 }
   0x2   :  { %s781_s15 = smov 8  }
   0x3   :  { %20 = dma.hbm_to_vmem [thread:$0]  %s13_s11, 256, %s15_s13, [#allocation3], %s780_s14, %s780_s14, %s781_s15  }
   0x4   :  { %777 = dma.done.wait [#allocation3], 256  }
   0x5   :  { %778 = vsyncadd [#allocation3], 4294967040  ;;  %v782_v0 = vmov 3   ;;  %v783_v1 = vmov 2   ;;  %v784_v2 = vmov 0   ;;  %v838_v3 = vld [vmem:[#allocation2] sm:$0xff] }
   0x6   :  { %709 = vset.pattern.permute.xlu2 %v782_v0  ;;  %707 = vset.pattern.permute.xlu1 %v783_v1  ;;  %v28_v4 = vld [vmem:[#allocation2 + $0x8] sm:$0xff]  ;;  %v785_v5 = vmov 4   ;;  %v786_v6 = vmov 1   ;;  %v787_v7 = vmov 5   ;;  %v788_v8 = vmov 6  }
   0x7   :  { %705 = vset.pattern.permute.xlu0 %v784_v2  ;;  %89 = vperm.xlu2 %709, %v28_v4   ;;  %v789_v9 = vmov 8   ;;  %v790_v10 = vmov 7   ;;  %v791_v11 = vmov 10   ;;  %v792_v12 = vmov 9   ;;  %v29_v29 = vld [vmem:[%s1103_s1] sm:$0x3f] }
   0x8   :  { %68 = vperm.xlu1 %707, %v838_v3   ;;  %32 = vperm.xlu0 %705, %v838_v3   ;;  %v793_v13 = vmov 14   ;;  %v794_v14 = vmov 19   ;;  %v795_v15 = vmov 11   ;;  %v796_v16 = vmov 24  }
   0x9   :  { %v797_v17 = vmov 13   ;;  %v798_v18 = vmov 12   ;;  %v799_v19 = vmov 16   ;;  %v800_v20 = vmov 15  }
   0xa   :  { %v801_v21 = vmov 18   ;;  %v802_v22 = vmov 17   ;;  %v803_v23 = vmov 29   ;;  %v804_v24 = vmov 21  }
   0xb   :  { %v805_v25 = vmov 20   ;;  %v806_v27 = vmov 23   ;;  %v807_v28 = vmov 22   ;;  %v36_v31 = vperm.slane %v29_v29, 0 }
   0xc   :  { %v808_v32 = vmov 34   ;;  %v37_v33 = vperm.slane %v29_v29, 2  ;;  %v38_v34 = vperm.slane %v29_v29, 4  ;;  %v52_v37 = vperm.slane %v29_v29, 1 }
   0xd   :  { %v53_v38 = vperm.slane %v29_v29, 3  ;;  %v54_v39 = vperm.slane %v29_v29, 5  ;;  %v809_v40 = vmov 26   ;;  %v810_v41 = vmov 25  }
   0xe   :  { %v42_v42 = vperm.slane %v36_v31, 0  ;;  %v43_v43 = vperm.slane %v37_v33, 0  ;;  %v44_v44 = vperm.slane %v38_v34, 0  ;;  %v58_v45 = vperm.slane %v52_v37, 1 }
   0xf   :  { %710 = vset.pattern.permute.xlu2 %v785_v5  ;;  %v59_v46 = vperm.slane %v53_v38, 1  ;;  %v60_v47 = vperm.slane %v54_v39, 1  ;;  %v811_v60 = vmov 27   ;;  %v812_v61 = vmov 28  }
  0x10   :  { %708 = vset.pattern.permute.xlu1 %v782_v0  ;;  %706 = vset.pattern.permute.xlu0 %v786_v6  ;;  %v818_v33 = vmov 35   ;;  %vm649_vm12 = vcmask 1040384   ;;  %vm651_vm13 = vcmask 1041408  }
  0x11   :  { %102 = vperm.xlu2 %710, %v838_v3   ;;  %84 = vperm.xlu1 %708, %v838_v3  }
  0x12   :  { %49 = vperm.xlu0 %706, %v838_v3  }
  0x19   :  { %712 = vset.pattern.permute.xlu2 %v787_v7  ;;  %711 = vset.pattern.permute.xlu1 %v785_v5 }
  0x1a   :  { %713 = vset.pattern.permute.xlu0 %v787_v7  ;;  %125 = vperm.xlu2 %712, %v838_v3   ;;  %v813_v7 = vmov 37  }
  0x1b   :  { %106 = vperm.xlu1 %711, %v28_v4   ;;  %129 = vperm.xlu0 %713, %v28_v4  }
  0x22   :  { %715 = vset.pattern.permute.xlu2 %v788_v8 }
  0x23   :  { %714 = vset.pattern.permute.xlu1 %v788_v8  ;;  %718 = vset.pattern.permute.xlu0 %v789_v9 }
  0x24   :  { %152 = vperm.xlu2 %715, %v28_v4   ;;  %148 = vperm.xlu1 %714, %v838_v3  }
  0x25   :  { %194 = vperm.xlu0 %718, %v838_v3  }
  0x2c   :  { %717 = vset.pattern.permute.xlu2 %v790_v10  ;;  %716 = vset.pattern.permute.xlu1 %v790_v10 }
  0x2d   :  { %723 = vset.pattern.permute.xlu0 %v791_v11  ;;  %175 = vperm.xlu2 %717, %v28_v4  }
  0x2e   :  { %171 = vperm.xlu1 %716, %v838_v3   ;;  %244 = vperm.xlu0 %723, %v28_v4  }
  0x35   :  { %720 = vset.pattern.permute.xlu2 %v792_v12 }
  0x36   :  { %719 = vset.pattern.permute.xlu1 %v789_v9  ;;  %217 = vperm.xlu2 %720, %v838_v3  }
  0x37   :  { %198 = vperm.xlu1 %719, %v28_v4   ;;  %728 = vset.pattern.permute.xlu0 %v793_v13 }
  0x38   :  { %318 = vperm.xlu0 %728, %v838_v3  }
  0x3e   :  { %722 = vset.pattern.permute.xlu2 %v791_v11 }
  0x3f   :  { %721 = vset.pattern.permute.xlu1 %v792_v12  ;;  %240 = vperm.xlu2 %722, %v838_v3  }
  0x40   :  { %221 = vperm.xlu1 %721, %v28_v4   ;;  %733 = vset.pattern.permute.xlu0 %v794_v14 }
  0x41   :  { %383 = vperm.xlu0 %733, %v838_v3  }
  0x47   :  { %725 = vset.pattern.permute.xlu2 %v795_v15 }
  0x48   :  { %724 = vset.pattern.permute.xlu1 %v795_v15  ;;  %267 = vperm.xlu2 %725, %v28_v4  }
  0x49   :  { %263 = vperm.xlu1 %724, %v838_v3   ;;  %738 = vset.pattern.permute.xlu0 %v796_v16 }
  0x4a   :  { %448 = vperm.xlu0 %738, %v838_v3  }
  0x50   :  { %727 = vset.pattern.permute.xlu2 %v797_v17  ;;  %v814_v17 = vmov 30  }
  0x51   :  { %726 = vset.pattern.permute.xlu1 %v798_v18  ;;  %305 = vperm.xlu2 %727, %v838_v3   ;;  %v815_v18 = vmov 31  }
  0x52   :  { %295 = vperm.xlu1 %726, %v838_v3   ;;  %743 = vset.pattern.permute.xlu0 %v803_v23 }
  0x53   :  { %516 = vperm.xlu0 %743, %v838_v3  }
  0x59   :  { %730 = vset.pattern.permute.xlu2 %v799_v19 }
  0x5a   :  { %729 = vset.pattern.permute.xlu1 %v800_v20  ;;  %344 = vperm.xlu2 %730, %v838_v3  }
  0x5b   :  { %331 = vperm.xlu1 %729, %v838_v3   ;;  %748 = vset.pattern.permute.xlu0 %v808_v32 }
  0x5c   :  { %590 = vperm.xlu0 %748, %v838_v3  }
  0x61   :  { %v864_v26 = vpop.permute.xlu2 %89 }
  0x62   :  { %732 = vset.pattern.permute.xlu2 %v801_v21 }
  0x63   :  { %731 = vset.pattern.permute.xlu1 %v802_v22  ;;  %370 = vperm.xlu2 %732, %v838_v3  }
  0x64   :  { %357 = vperm.xlu1 %731, %v838_v3   ;;  %752 = vset.pattern.permute.xlu0 %v813_v7 }
  0x6b   :  { %735 = vset.pattern.permute.xlu2 %v804_v24  ;;  %v872_v36 = vpop.permute.xlu2 %102 }
  0x6c   :  { %734 = vset.pattern.permute.xlu1 %v805_v25  ;;  %409 = vperm.xlu2 %735, %v838_v3  }
  0x6d   :  { %396 = vperm.xlu1 %734, %v838_v3  }
  0x74   :  { %737 = vset.pattern.permute.xlu2 %v806_v27  ;;  %v878_v56 = vpop.permute.xlu2 %125 }
  0x75   :  { %736 = vset.pattern.permute.xlu1 %v807_v28  ;;  %435 = vperm.xlu2 %737, %v838_v3  }
  0x76   :  { %422 = vperm.xlu1 %736, %v838_v3  }
  0x7a   :  { %v69_v30 = vpop.permute.xlu1 %68  ;;  %v33_v35 = vpop.permute.xlu0 %32 }
  0x7b   :  { %v45_v48 = vmul.f32 %v42_v42, %v33_v35  ;;  %v46_v49 = vmul.f32 %v43_v43, %v33_v35  ;;  %v47_v50 = vmul.f32 %v44_v44, %v33_v35  ;;  %v819_v35 = vmov 36  }
  0x7d   :  { %740 = vset.pattern.permute.xlu2 %v809_v40 }
  0x7e   :  { %739 = vset.pattern.permute.xlu1 %v810_v41  ;;  %474 = vperm.xlu2 %740, %v838_v3   ;;  %v892_v13 = vpop.permute.xlu2 %152 }
  0x7f   :  { %461 = vperm.xlu1 %739, %v838_v3  }
  0x83   :  { %v876_v51 = vpop.permute.xlu1 %84 }
  0x84   :  { %v50_v52 = vpop.permute.xlu0 %49 }
  0x85   :  { %v61_v53 = vmul.f32 %v58_v45, %v50_v52  ;;  %v62_v54 = vmul.f32 %v59_v46, %v50_v52  ;;  %v63_v55 = vmul.f32 %v60_v47, %v50_v52 }
  0x86   :  { %742 = vset.pattern.permute.xlu2 %v812_v61 }
  0x87   :  { %v64_v57 = vadd.f32 %v61_v53, %v45_v48  ;;  %v65_v58 = vadd.f32 %v62_v54, %v46_v49  ;;  %v66_v59 = vadd.f32 %v63_v55, %v47_v50  ;;  %741 = vset.pattern.permute.xlu1 %v811_v60  ;;  %500 = vperm.xlu2 %742, %v838_v3   ;;  %v908_v31 = vpop.permute.xlu2 %175 }
  0x88   :  { %487 = vperm.xlu1 %741, %v838_v3  }
  0x89   :  { %v71_v62 = vadd.f32 %v69_v30, %v64_v57  ;;  %v72_v63 = vadd.f32 %v69_v30, %v65_v58  ;;  %v73_v0 = vadd.f32 %v69_v30, %v66_v59  ;;  %v816_v30 = vmov 32  }
  0x8b   :  { %vm74_vm0 = vcmp.gt.f32.partialorder %v71_v62, 0.0  ;;  %vm75_vm1 = vcmp.gt.f32.partialorder %v72_v63, 0.0  ;;  %vm76_vm2 = vcmp.gt.f32.partialorder %v73_v0, 0.0  ;;  %v77_v1 = vmul.f32 0.01, %v71_v62 }
  0x8c   :  { %v78_v2 = vmul.f32 0.01, %v72_v63  ;;  %v79_v4 = vmul.f32 0.01, %v73_v0 }
  0x8d   :  { %v882_v5 = vsel %vm74_vm0, %v71_v62, %v77_v1  ;;  %v107_v6 = vpop.permute.xlu1 %106  ;;  %v921_v42 = vpop.permute.xlu0 %129 }
  0x8e   :  { %v885_v8 = vsel %vm75_vm1, %v72_v63, %v78_v2  ;;  %v887_v9 = vsel %vm76_vm2, %v73_v0, %v79_v4  ;;  %v92_v10 = vperm.slane %v882_v5, 0  ;;  %v109_v15 = vperm.slane %v882_v5, 1 }
  0x8f   :  { %v93_v11 = vperm.slane %v885_v8, 0  ;;  %v94_v12 = vperm.slane %v887_v9, 0  ;;  %v110_v16 = vperm.slane %v885_v8, 1  ;;  %745 = vset.pattern.permute.xlu2 %v815_v18  ;;  %v111_v21 = vperm.slane %v887_v9, 1 }
  0x90   :  { %v98_v14 = vmul.f32 %v92_v10, %v864_v26  ;;  %744 = vset.pattern.permute.xlu1 %v814_v17  ;;  %v115_v22 = vmul.f32 %v109_v15, %v107_v6  ;;  %542 = vperm.xlu2 %745, %v838_v3   ;;  %v913_v34 = vpop.permute.xlu2 %217  ;;  %v112_v37 = vmul.f32 %v109_v15, %v872_v36  ;;  %v132_v44 = vperm.slane %v882_v5, 2 }
  0x91   :  { %v99_v19 = vmul.f32 %v93_v11, %v864_v26  ;;  %523 = vperm.xlu1 %744, %v838_v3   ;;  %v100_v20 = vmul.f32 %v94_v12, %v864_v26  ;;  %v116_v23 = vmul.f32 %v110_v16, %v107_v6  ;;  %v117_v24 = vmul.f32 %v111_v21, %v107_v6 }
  0x92   :  { %v902_v25 = vadd.f32 %v115_v22, %v98_v14  ;;  %v817_v26 = vmov 33   ;;  %v113_v38 = vmul.f32 %v110_v16, %v872_v36  ;;  %v95_v39 = vmul.f32 %v92_v10, %v876_v51 }
  0x93   :  { %v904_v27 = vadd.f32 %v116_v23, %v99_v19  ;;  %v906_v28 = vadd.f32 %v117_v24, %v100_v20  ;;  %v96_v40 = vmul.f32 %v93_v11, %v876_v51  ;;  %v114_v41 = vmul.f32 %v111_v21, %v872_v36 }
  0x94   :  { %v97_v43 = vmul.f32 %v94_v12, %v876_v51  ;;  %v133_v45 = vperm.slane %v885_v8, 2  ;;  %v134_v46 = vperm.slane %v887_v9, 2  ;;  %v118_v47 = vadd.f32 %v112_v37, %v95_v39 }
  0x95   :  { %v119_v48 = vadd.f32 %v113_v38, %v96_v40  ;;  %v155_v49 = vperm.slane %v882_v5, 3  ;;  %v156_v50 = vperm.slane %v885_v8, 3  ;;  %v178_v36 = vperm.slane %v882_v5, 4 }
  0x96   :  { %v149_v29 = vpop.permute.xlu1 %148  ;;  %v179_v53 = vperm.slane %v885_v8, 4  ;;  %v120_v54 = vadd.f32 %v114_v41, %v97_v43  ;;  %v157_v51 = vperm.slane %v887_v9, 3  ;;  %v135_v55 = vmul.f32 %v132_v44, %v878_v56 }
  0x97   :  { %v136_v57 = vmul.f32 %v133_v45, %v878_v56  ;;  %v158_v58 = vmul.f32 %v155_v49, %v149_v29  ;;  %v159_v59 = vmul.f32 %v156_v50, %v149_v29  ;;  %v180_v60 = vperm.slane %v887_v9, 4  ;;  %v195_v12 = vpop.permute.xlu0 %194 }
  0x98   :  { %747 = vset.pattern.permute.xlu2 %v817_v26  ;;  %v137_v61 = vmul.f32 %v134_v46, %v878_v56  ;;  %v160_v62 = vmul.f32 %v157_v51, %v149_v29  ;;  %v141_v63 = vadd.f32 %v135_v55, %v118_v47  ;;  %v201_v14 = vperm.slane %v882_v5, 5 }
  0x99   :  { %746 = vset.pattern.permute.xlu1 %v816_v30  ;;  %574 = vperm.xlu2 %747, %v838_v3   ;;  %v142_v0 = vadd.f32 %v136_v57, %v119_v48  ;;  %v241_v6 = vpop.permute.xlu2 %240  ;;  %v203_v17 = vperm.slane %v887_v9, 5  ;;  %v224_v20 = vperm.slane %v882_v5, 6  ;;  %v225_v21 = vperm.slane %v885_v8, 6 }
  0x9a   :  { %558 = vperm.xlu1 %746, %v838_v3   ;;  %v143_v4 = vadd.f32 %v137_v61, %v120_v54  ;;  %v164_v10 = vadd.f32 %v158_v58, %v141_v63  ;;  %v204_v22 = vmul.f32 %v201_v14, %v195_v12  ;;  %v226_v24 = vperm.slane %v887_v9, 6 }
  0x9b   :  { %v165_v56 = vadd.f32 %v159_v59, %v142_v0  ;;  %v206_v29 = vmul.f32 %v203_v17, %v195_v12  ;;  %v228_v37 = vmul.f32 %v225_v21, %v913_v34  ;;  %v138_v38 = vmul.f32 %v132_v44, %v921_v42 }
  0x9c   :  { %v166_v11 = vadd.f32 %v160_v62, %v143_v4  ;;  %v229_v39 = vmul.f32 %v226_v24, %v913_v34  ;;  %v247_v40 = vperm.slane %v882_v5, 7  ;;  %v248_v41 = vperm.slane %v885_v8, 7 }
  0x9d   :  { %v139_v48 = vmul.f32 %v133_v45, %v921_v42  ;;  %v249_v54 = vperm.slane %v887_v9, 7  ;;  %v144_v57 = vadd.f32 %v138_v38, %v902_v25  ;;  %v140_v44 = vmul.f32 %v134_v46, %v921_v42 }
  0x9e   :  { %v250_v58 = vmul.f32 %v247_v40, %v241_v6  ;;  %v251_v59 = vmul.f32 %v248_v41, %v241_v6  ;;  %v161_v63 = vmul.f32 %v155_v49, %v892_v13  ;;  %v162_v25 = vmul.f32 %v156_v50, %v892_v13 }
  0x9f   :  { %v252_v62 = vmul.f32 %v249_v54, %v241_v6  ;;  %v146_v45 = vadd.f32 %v140_v44, %v906_v28  ;;  %v184_v49 = vmul.f32 %v178_v36, %v908_v31  ;;  %v185_v28 = vmul.f32 %v179_v53, %v908_v31 }
  0xa0   :  { %v172_v32 = vpop.permute.xlu1 %171  ;;  %v167_v4 = vadd.f32 %v161_v63, %v144_v57  ;;  %v186_v50 = vmul.f32 %v180_v60, %v908_v31  ;;  %v245_v31 = vpop.permute.xlu0 %244 }
  0xa1   :  { %750 = vset.pattern.permute.xlu2 %v819_v35  ;;  %v181_v1 = vmul.f32 %v178_v36, %v172_v32  ;;  %v182_v2 = vmul.f32 %v179_v53, %v172_v32  ;;  %v227_v35 = vmul.f32 %v224_v20, %v913_v34  ;;  %v145_v34 = vadd.f32 %v139_v48, %v904_v27 }
  0xa2   :  { %749 = vset.pattern.permute.xlu1 %v818_v33  ;;  %622 = vperm.xlu2 %750, %v838_v3   ;;  %v958_v33 = vpop.permute.xlu2 %267  ;;  %v163_v27 = vmul.f32 %v157_v51, %v892_v13  ;;  %v255_v48 = vmul.f32 %v249_v54, %v245_v31 }
  0xa3   :  { %606 = vperm.xlu1 %749, %v838_v3   ;;  %v187_v15 = vadd.f32 %v181_v1, %v164_v10  ;;  %v188_v16 = vadd.f32 %v182_v2, %v165_v56  ;;  %v168_v42 = vadd.f32 %v162_v25, %v145_v34 }
  0xa4   :  { %v169_v56 = vadd.f32 %v163_v27, %v146_v45 }
  0xa5   :  { %v210_v30 = vadd.f32 %v204_v22, %v187_v15 }
  0xa7   :  { %v233_v43 = vadd.f32 %v227_v35, %v210_v30 }
  0xa9   :  { %v929_v52 = vpop.permute.xlu1 %198  ;;  %v256_v0 = vadd.f32 %v250_v58, %v233_v43 }
  0xaa   :  { %v319_v54 = vpop.permute.xlu0 %318 }
  0xab   :  { %751 = vset.pattern.permute.xlu1 %v813_v7  ;;  %v183_v7 = vmul.f32 %v180_v60, %v172_v32  ;;  %v306_v46 = vpop.permute.xlu2 %305  ;;  %v192_v60 = vadd.f32 %v186_v50, %v169_v56 }
  0xac   :  { %638 = vperm.xlu1 %751, %v838_v3   ;;  %v202_v3 = vperm.slane %v885_v8, 5  ;;  %v209_v8 = vmul.f32 %v203_v17, %v929_v52 }
  0xad   :  { %v189_v18 = vadd.f32 %v183_v7, %v166_v11  ;;  %v207_v11 = vmul.f32 %v201_v14, %v929_v52 }
  0xae   :  { %v205_v23 = vmul.f32 %v202_v3, %v195_v12  ;;  %v190_v12 = vadd.f32 %v184_v49, %v167_v4  ;;  %v208_v13 = vmul.f32 %v202_v3, %v929_v52 }
  0xaf   :  { %v212_v32 = vadd.f32 %v206_v29, %v189_v18 }
  0xb0   :  { %v211_v26 = vadd.f32 %v205_v23, %v188_v16  ;;  %v191_v16 = vadd.f32 %v185_v28, %v168_v42  ;;  %v213_v14 = vadd.f32 %v207_v11, %v190_v12 }
  0xb1   :  { %v235_v55 = vadd.f32 %v229_v39, %v212_v32  ;;  %v215_v32 = vadd.f32 %v209_v8, %v192_v60 }
  0xb2   :  { %v953_v19 = vpop.permute.xlu1 %221  ;;  %v234_v47 = vadd.f32 %v228_v37, %v211_v26  ;;  %v214_v22 = vadd.f32 %v208_v13, %v191_v16  ;;  %v253_v26 = vmul.f32 %v247_v40, %v245_v31 }
  0xb3   :  { %v258_v2 = vadd.f32 %v252_v62, %v235_v55  ;;  %v230_v53 = vmul.f32 %v224_v20, %v953_v19  ;;  %v231_v18 = vmul.f32 %v225_v21, %v953_v19  ;;  %v232_v3 = vmul.f32 %v226_v24, %v953_v19 }
  0xb4   :  { %v257_v1 = vadd.f32 %v251_v59, %v234_v47  ;;  %v1002_v20 = vpop.permute.xlu2 %344  ;;  %v254_v24 = vmul.f32 %v248_v41, %v245_v31 }
  0xb5   :  { %v236_v52 = vadd.f32 %v230_v53, %v213_v14  ;;  %v237_v17 = vadd.f32 %v231_v18, %v214_v22  ;;  %v238_v38 = vadd.f32 %v232_v3, %v215_v32 }
  0xb7   :  { %v259_v55 = vadd.f32 %v253_v26, %v236_v52  ;;  %v260_v57 = vadd.f32 %v254_v24, %v237_v17  ;;  %v261_v62 = vadd.f32 %v255_v48, %v238_v38 }
  0xb9   :  { %v274_v4 = vadd.f32 %v958_v33, %v260_v57  ;;  %v275_v49 = vadd.f32 %v958_v33, %v261_v62 }
  0xbb   :  { %v264_v61 = vpop.permute.xlu1 %263  ;;  %vm280_vm7 = vcmp.gt.f32.partialorder %v274_v4, 0.0  ;;  %vm281_vm8 = vcmp.gt.f32.partialorder %v275_v49, 0.0  ;;  %v286_v32 = vmul.f32 0.01, %v274_v4  ;;  %v287_v52 = vmul.f32 0.01, %v275_v49 }
  0xbc   :  { %v270_v7 = vadd.f32 %v264_v61, %v256_v0  ;;  %v271_v10 = vadd.f32 %v264_v61, %v257_v1  ;;  %v272_v6 = vadd.f32 %v264_v61, %v258_v2  ;;  %v273_v2 = vadd.f32 %v958_v33, %v259_v55 }
  0xbd   :  { %v371_v56 = vpop.permute.xlu2 %370  ;;  %v1037_v48 = vsel %vm280_vm7, %v274_v4, %v286_v32 }
  0xbe   :  { %v282_v51 = vmul.f32 0.01, %v270_v7  ;;  %v283_v15 = vmul.f32 0.01, %v271_v10  ;;  %vm276_vm3 = vcmp.gt.f32.partialorder %v270_v7, 0.0  ;;  %vm277_vm4 = vcmp.gt.f32.partialorder %v271_v10, 0.0 }
  0xbf   :  { %v284_v5 = vmul.f32 0.01, %v272_v6  ;;  %vm278_vm5 = vcmp.gt.f32.partialorder %v272_v6, 0.0  ;;  %vm279_vm6 = vcmp.gt.f32.partialorder %v273_v2, 0.0  ;;  %v285_v18 = vmul.f32 0.01, %v273_v2 }
  0xc0   :  { %v996_v23 = vsel %vm276_vm3, %v270_v7, %v282_v51  ;;  %v998_v29 = vsel %vm277_vm4, %v271_v10, %v283_v15 }
  0xc1   :  { %v1000_v30 = vsel %vm278_vm5, %v272_v6, %v284_v5  ;;  %v298_v21 = vperm.slane %v996_v23, 0  ;;  %v299_v35 = vperm.slane %v998_v29, 0  ;;  %v308_v37 = vperm.slane %v996_v23, 1 }
  0xc2   :  { %v309_v19 = vperm.slane %v998_v29, 1  ;;  %v300_v39 = vperm.slane %v1000_v30, 0  ;;  %v310_v43 = vperm.slane %v1000_v30, 1  ;;  %v321_v34 = vperm.slane %v996_v23, 2 }
  0xc3   :  { %v311_v61 = vmul.f32 %v308_v37, %v306_v46  ;;  %v322_v41 = vperm.slane %v998_v29, 2  ;;  %v323_v0 = vperm.slane %v1000_v30, 2  ;;  %v334_v25 = vperm.slane %v996_v23, 3 }
  0xc4   :  { %v296_v36 = vpop.permute.xlu1 %295  ;;  %v312_v44 = vmul.f32 %v309_v19, %v306_v46  ;;  %v313_v63 = vmul.f32 %v310_v43, %v306_v46  ;;  %v335_v9 = vperm.slane %v998_v29, 3  ;;  %v336_v10 = vperm.slane %v1000_v30, 3 }
  0xc5   :  { %v301_v40 = vmul.f32 %v298_v21, %v296_v36  ;;  %v302_v47 = vmul.f32 %v299_v35, %v296_v36  ;;  %v303_v58 = vmul.f32 %v300_v39, %v296_v36  ;;  %v324_v27 = vmul.f32 %v321_v34, %v319_v54 }
  0xc6   :  { %v325_v42 = vmul.f32 %v322_v41, %v319_v54  ;;  %v326_v28 = vmul.f32 %v323_v0, %v319_v54  ;;  %v347_v13 = vperm.slane %v996_v23, 4  ;;  %v348_v51 = vperm.slane %v998_v29, 4 }
  0xc7   :  { %v314_v1 = vadd.f32 %v311_v61, %v301_v40  ;;  %v315_v45 = vadd.f32 %v312_v44, %v302_v47  ;;  %v316_v7 = vadd.f32 %v313_v63, %v303_v58  ;;  %v349_v16 = vperm.slane %v1000_v30, 4 }
  0xc8   :  { %v360_v53 = vperm.slane %v996_v23, 5  ;;  %v361_v33 = vperm.slane %v998_v29, 5  ;;  %v362_v60 = vperm.slane %v1000_v30, 5  ;;  %v350_v14 = vmul.f32 %v347_v13, %v1002_v20 }
  0xc9   :  { %v327_v11 = vadd.f32 %v324_v27, %v314_v1  ;;  %v328_v12 = vadd.f32 %v325_v42, %v315_v45  ;;  %v329_v15 = vadd.f32 %v326_v28, %v316_v7  ;;  %v351_v22 = vmul.f32 %v348_v51, %v1002_v20 }
  0xca   :  { %v352_v17 = vmul.f32 %v349_v16, %v1002_v20  ;;  %v373_v35 = vperm.slane %v996_v23, 6  ;;  %v374_v37 = vperm.slane %v998_v29, 6  ;;  %v375_v38 = vperm.slane %v1000_v30, 6 }
  0xcb   :  { %v1034_v47 = vsel %vm279_vm6, %v273_v2, %v285_v18  ;;  %v1040_v20 = vsel %vm281_vm8, %v275_v49, %v287_v52  ;;  %v386_v61 = vperm.slane %v996_v23, 7  ;;  %v387_v44 = vperm.slane %v998_v29, 7 }
  0xcc   :  { %v376_v57 = vmul.f32 %v373_v35, %v371_v56  ;;  %v377_v58 = vmul.f32 %v374_v37, %v371_v56  ;;  %v378_v34 = vmul.f32 %v375_v38, %v371_v56  ;;  %v388_v62 = vperm.slane %v1000_v30, 7 }
  0xcd   :  { %v332_v59 = vpop.permute.xlu1 %331  ;;  %v399_v1 = vperm.slane %v1034_v47, 0  ;;  %v400_v45 = vperm.slane %v1037_v48, 0  ;;  %v401_v54 = vperm.slane %v1040_v20, 0  ;;  %v412_v30 = vperm.slane %v1034_v47, 1 }
  0xce   :  { %v337_v6 = vmul.f32 %v334_v25, %v332_v59  ;;  %v338_v46 = vmul.f32 %v335_v9, %v332_v59  ;;  %v339_v50 = vmul.f32 %v336_v10, %v332_v59  ;;  %v410_v59 = vpop.permute.xlu2 %409  ;;  %v384_v25 = vpop.permute.xlu0 %383  ;;  %v414_v49 = vperm.slane %v1040_v20, 1 }
  0xcf   :  { %v389_v2 = vmul.f32 %v386_v61, %v384_v25  ;;  %v390_v4 = vmul.f32 %v387_v44, %v384_v25  ;;  %v391_v10 = vmul.f32 %v388_v62, %v384_v25  ;;  %v427_v13 = vperm.slane %v1040_v20, 2 }
  0xd0   :  { %v340_v5 = vadd.f32 %v337_v6, %v327_v11  ;;  %v341_v36 = vadd.f32 %v338_v46, %v328_v12  ;;  %v342_v31 = vadd.f32 %v339_v50, %v329_v15  ;;  %v413_v46 = vperm.slane %v1037_v48, 1 }
  0xd1   :  { %v425_v11 = vperm.slane %v1034_v47, 2  ;;  %v426_v12 = vperm.slane %v1037_v48, 2  ;;  %v415_v51 = vmul.f32 %v412_v30, %v410_v59  ;;  %v440_v32 = vperm.slane %v1040_v20, 3 }
  0xd2   :  { %v353_v19 = vadd.f32 %v350_v14, %v340_v5  ;;  %v354_v24 = vadd.f32 %v351_v22, %v341_v36  ;;  %v355_v39 = vadd.f32 %v352_v17, %v342_v31  ;;  %v416_v15 = vmul.f32 %v413_v46, %v410_v59 }
  0xd3   :  { %v417_v36 = vmul.f32 %v414_v49, %v410_v59  ;;  %v438_v14 = vperm.slane %v1034_v47, 3  ;;  %v439_v22 = vperm.slane %v1037_v48, 3  ;;  %v451_v17 = vperm.slane %v1034_v47, 4 }
  0xd4   :  { %v466_v59 = vperm.slane %v1040_v20, 5  ;;  %v491_v30 = vperm.slane %v1037_v48, 7 }
  0xd6   :  { %v358_v8 = vpop.permute.xlu1 %357  ;;  %v436_v16 = vpop.permute.xlu2 %435 }
  0xd7   :  { %v363_v3 = vmul.f32 %v360_v53, %v358_v8  ;;  %v364_v26 = vmul.f32 %v361_v33, %v358_v8  ;;  %v365_v21 = vmul.f32 %v362_v60, %v358_v8  ;;  %v441_v35 = vmul.f32 %v438_v14, %v436_v16 }
  0xd8   :  { %v442_v37 = vmul.f32 %v439_v22, %v436_v16  ;;  %v443_v38 = vmul.f32 %v440_v32, %v436_v16 }
  0xd9   :  { %v366_v43 = vadd.f32 %v363_v3, %v353_v19  ;;  %v367_v40 = vadd.f32 %v364_v26, %v354_v24  ;;  %v368_v55 = vadd.f32 %v365_v21, %v355_v39  ;;  %v452_v21 = vperm.slane %v1037_v48, 4  ;;  %v449_v24 = vpop.permute.xlu0 %448 }
  0xda   :  { %v453_v19 = vperm.slane %v1040_v20, 4  ;;  %v454_v61 = vmul.f32 %v451_v17, %v449_v24 }
  0xdb   :  { %v379_v63 = vadd.f32 %v376_v57, %v366_v43  ;;  %v380_v0 = vadd.f32 %v377_v58, %v367_v40  ;;  %v381_v9 = vadd.f32 %v378_v34, %v368_v55  ;;  %v464_v40 = vperm.slane %v1034_v47, 5 }
  0xdc   :  { %v465_v55 = vperm.slane %v1037_v48, 5  ;;  %v455_v44 = vmul.f32 %v452_v21, %v449_v24 }
  0xdd   :  { %v392_v27 = vadd.f32 %v389_v2, %v379_v63  ;;  %v393_v42 = vadd.f32 %v390_v4, %v380_v0  ;;  %v394_v6 = vadd.f32 %v391_v10, %v381_v9  ;;  %v456_v63 = vmul.f32 %v453_v19, %v449_v24 }
  0xde   :  { %v475_v34 = vpop.permute.xlu2 %474  ;;  %v477_v9 = vperm.slane %v1034_v47, 6 }
  0xdf   :  { %v397_v41 = vpop.permute.xlu1 %396 }
  0xe0   :  { %v402_v7 = vmul.f32 %v399_v1, %v397_v41  ;;  %v403_v23 = vmul.f32 %v400_v45, %v397_v41  ;;  %v404_v29 = vmul.f32 %v401_v54, %v397_v41  ;;  %v478_v54 = vperm.slane %v1037_v48, 6 }
  0xe1   :  { %v480_v10 = vmul.f32 %v477_v9, %v475_v34 }
  0xe2   :  { %v405_v28 = vadd.f32 %v402_v7, %v392_v27  ;;  %v406_v50 = vadd.f32 %v403_v23, %v393_v42  ;;  %v407_v56 = vadd.f32 %v404_v29, %v394_v6  ;;  %v479_v7 = vperm.slane %v1040_v20, 6 }
  0xe3   :  { %v481_v29 = vmul.f32 %v478_v54, %v475_v34  ;;  %v490_v42 = vperm.slane %v1034_v47, 7  ;;  %v492_v6 = vperm.slane %v1040_v20, 7 }
  0xe4   :  { %v418_v18 = vadd.f32 %v415_v51, %v405_v28  ;;  %v419_v31 = vadd.f32 %v416_v15, %v406_v50  ;;  %v420_v60 = vadd.f32 %v417_v36, %v407_v56  ;;  %v482_v27 = vmul.f32 %v479_v7, %v475_v34 }
  0xe6   :  { %v501_v46 = vpop.permute.xlu2 %500 }
  0xe8   :  { %v423_v5 = vpop.permute.xlu1 %422 }
  0xe9   :  { %v428_v8 = vmul.f32 %v425_v11, %v423_v5  ;;  %v429_v53 = vmul.f32 %v426_v12, %v423_v5  ;;  %v430_v33 = vmul.f32 %v427_v13, %v423_v5 }
  0xeb   :  { %v431_v3 = vadd.f32 %v428_v8, %v418_v18  ;;  %v432_v26 = vadd.f32 %v429_v53, %v419_v31  ;;  %v433_v52 = vadd.f32 %v430_v33, %v420_v60 }
  0xed   :  { %v444_v39 = vadd.f32 %v441_v35, %v431_v3  ;;  %v445_v43 = vadd.f32 %v442_v37, %v432_v26  ;;  %v446_v57 = vadd.f32 %v443_v38, %v433_v52  ;;  %v517_v26 = vpop.permute.xlu0 %516 }
  0xee   :  { %v543_v18 = vpop.permute.xlu2 %542 }
  0xef   :  { %v457_v1 = vadd.f32 %v454_v61, %v444_v39  ;;  %v458_v45 = vadd.f32 %v455_v44, %v445_v43  ;;  %v459_v25 = vadd.f32 %v456_v63, %v446_v57 }
  0xf1   :  { %v462_v58 = vpop.permute.xlu1 %461 }
  0xf2   :  { %v467_v41 = vmul.f32 %v464_v40, %v462_v58  ;;  %v468_v62 = vmul.f32 %v465_v55, %v462_v58  ;;  %v469_v0 = vmul.f32 %v466_v59, %v462_v58 }
  0xf4   :  { %v470_v2 = vadd.f32 %v467_v41, %v457_v1  ;;  %v471_v4 = vadd.f32 %v468_v62, %v458_v45  ;;  %v472_v23 = vadd.f32 %v469_v0, %v459_v25 }
  0xf6   :  { %v483_v28 = vadd.f32 %v480_v10, %v470_v2  ;;  %v484_v50 = vadd.f32 %v481_v29, %v471_v4  ;;  %v485_v56 = vadd.f32 %v482_v27, %v472_v23  ;;  %v575_v41 = vpop.permute.xlu2 %574  ;;  %v591_v10 = vpop.permute.xlu0 %590 }
  0xfa   :  { %v488_v49 = vpop.permute.xlu1 %487 }
  0xfb   :  { %v493_v11 = vmul.f32 %v490_v42, %v488_v49  ;;  %v494_v12 = vmul.f32 %v491_v30, %v488_v49  ;;  %v495_v13 = vmul.f32 %v492_v6, %v488_v49 }
  0xfd   :  { %v496_v51 = vadd.f32 %v493_v11, %v483_v28  ;;  %v497_v15 = vadd.f32 %v494_v12, %v484_v50  ;;  %v498_v16 = vadd.f32 %v495_v13, %v485_v56 }
  0xff   :  { %v503_v5 = vadd.f32 %v501_v46, %v496_v51  ;;  %v504_v36 = vadd.f32 %v501_v46, %v497_v15  ;;  %v505_v8 = vadd.f32 %v501_v46, %v498_v16 }
 0x101   :  { %vm506_vm9 = vcmp.gt.f32.partialorder %v503_v5, 0.0  ;;  %vm507_vm10 = vcmp.gt.f32.partialorder %v504_v36, 0.0  ;;  %vm508_vm11 = vcmp.gt.f32.partialorder %v505_v8, 0.0  ;;  %v509_v47 = vmul.f32 0.01, %v503_v5 }
 0x102   :  { %v510_v48 = vmul.f32 0.01, %v504_v36  ;;  %v511_v20 = vmul.f32 0.01, %v505_v8 }
 0x103   :  { %v1069_v53 = vsel %vm506_vm9, %v503_v5, %v509_v47  ;;  %v524_v33 = vpop.permute.xlu1 %523 }
 0x104   :  { %v1071_v31 = vsel %vm507_vm10, %v504_v36, %v510_v48  ;;  %v1073_v60 = vsel %vm508_vm11, %v505_v8, %v511_v20  ;;  %v529_v14 = vrot.slane %v1069_v53, 1  ;;  %v519_v21 = vmul.f32 %v517_v26, %v1069_v53 }
 0x105   :  { %v530_v22 = vrot.slane %v1071_v31, 1  ;;  %v531_v3 = vrot.slane %v1073_v60, 1  ;;  %v520_v35 = vmul.f32 %v517_v26, %v1071_v31  ;;  %v521_v37 = vmul.f32 %v517_v26, %v1073_v60 }
 0x106   :  { %v535_v32 = vmul.f32 %v529_v14, %v524_v33  ;;  %v545_v39 = vrot.slane %v1069_v53, 2  ;;  %v546_v40 = vrot.slane %v1071_v31, 2  ;;  %v547_v55 = vrot.slane %v1073_v60, 2 }
 0x107   :  { %v536_v52 = vmul.f32 %v530_v22, %v524_v33  ;;  %v537_v17 = vmul.f32 %v531_v3, %v524_v33  ;;  %v561_v57 = vrot.slane %v1069_v53, 3  ;;  %v562_v58 = vrot.slane %v1071_v31, 3 }
 0x108   :  { %v538_v19 = vadd.f32 %v535_v32, %v519_v21  ;;  %v578_v59 = vrot.slane %v1071_v31, 4  ;;  %v579_v61 = vrot.slane %v1073_v60, 4  ;;  %v551_v44 = vmul.f32 %v545_v39, %v543_v18 }
 0x109   :  { %v539_v24 = vadd.f32 %v536_v52, %v520_v35  ;;  %v540_v38 = vadd.f32 %v537_v17, %v521_v37  ;;  %v563_v34 = vrot.slane %v1073_v60, 3  ;;  %v552_v62 = vmul.f32 %v546_v40, %v543_v18 }
 0x10a   :  { %v553_v63 = vmul.f32 %v547_v55, %v543_v18  ;;  %v577_v45 = vrot.slane %v1069_v53, 4  ;;  %v554_v25 = vadd.f32 %v551_v44, %v538_v19  ;;  %v594_v54 = vrot.slane %v1071_v31, 5  ;;  %v623_v18 = vpop.permute.xlu2 %622 }
 0x10b   :  { %v555_v2 = vadd.f32 %v552_v62, %v539_v24  ;;  %v584_v7 = vmul.f32 %v578_v59, %v575_v41  ;;  %v595_v23 = vrot.slane %v1073_v60, 5  ;;  %v585_v27 = vmul.f32 %v579_v61, %v575_v41 }
 0x10c   :  { %v559_v43 = vpop.permute.xlu1 %558  ;;  %v556_v4 = vadd.f32 %v553_v63, %v540_v38  ;;  %v593_v42 = vrot.slane %v1069_v53, 5  ;;  %v583_v46 = vmul.f32 %v577_v45, %v575_v41  ;;  %v600_v49 = vmul.f32 %v594_v54, %v591_v10 }
 0x10d   :  { %v567_v0 = vmul.f32 %v561_v57, %v559_v43  ;;  %v568_v1 = vmul.f32 %v562_v58, %v559_v43  ;;  %v569_v9 = vmul.f32 %v563_v34, %v559_v43  ;;  %v610_v56 = vrot.slane %v1071_v31, 6 }
 0x10e   :  { %v601_v11 = vmul.f32 %v595_v23, %v591_v10  ;;  %v609_v51 = vrot.slane %v1069_v53, 6  ;;  %v611_v15 = vrot.slane %v1073_v60, 6  ;;  %v626_v16 = vrot.slane %v1071_v31, 7 }
 0x10f   :  { %v570_v29 = vadd.f32 %v567_v0, %v554_v25  ;;  %v571_v30 = vadd.f32 %v568_v1, %v555_v2  ;;  %v572_v6 = vadd.f32 %v569_v9, %v556_v4  ;;  %v627_v5 = vrot.slane %v1073_v60, 7 }
 0x110   :  { %v599_v36 = vmul.f32 %v593_v42, %v591_v10  ;;  %v625_v14 = vrot.slane %v1069_v53, 7  ;;  %v632_v32 = vmul.f32 %v626_v16, %v623_v18  ;;  %v654_v37 = vlaneseq }
 0x111   :  { %v587_v28 = vadd.f32 %v584_v7, %v571_v30  ;;  %v588_v50 = vadd.f32 %v585_v27, %v572_v6  ;;  %v586_v12 = vadd.f32 %v583_v46, %v570_v29  ;;  %v633_v52 = vmul.f32 %v627_v5, %v623_v18 }
 0x112   :  { %v631_v21 = vmul.f32 %v625_v14, %v623_v18  ;;  %vm656_vm14 = vcmp.lt.s32.totalorder %v654_v37, 384 }
 0x113   :  { %v603_v47 = vadd.f32 %v600_v49, %v587_v28  ;;  %v604_v48 = vadd.f32 %v601_v11, %v588_v50  ;;  %v602_v22 = vadd.f32 %v599_v36, %v586_v12 }
 0x115   :  { %v607_v13 = vpop.permute.xlu1 %606 }
 0x116   :  { %v616_v8 = vmul.f32 %v610_v56, %v607_v13  ;;  %v615_v20 = vmul.f32 %v609_v51, %v607_v13  ;;  %v617_v33 = vmul.f32 %v611_v15, %v607_v13 }
 0x118   :  { %v619_v3 = vadd.f32 %v616_v8, %v603_v47  ;;  %v620_v26 = vadd.f32 %v617_v33, %v604_v48  ;;  %v618_v17 = vadd.f32 %v615_v20, %v602_v22 }
 0x11a   :  { %v635_v35 = vadd.f32 %v632_v32, %v619_v3  ;;  %v636_v31 = vadd.f32 %v633_v52, %v620_v26  ;;  %v634_v19 = vadd.f32 %v631_v21, %v618_v17 }
 0x11e   :  { %v639_v60 = vpop.permute.xlu1 %638 }
 0x11f   :  { %v642_v24 = vadd.f32 %v639_v60, %v635_v35  ;;  %v643_v38 = vadd.f32 %v639_v60, %v636_v31  ;;  %v641_v39 = vadd.f32 %v639_v60, %v634_v19 }
 0x121   :  { %v647_v43 = vrot.slane %v642_v24, 7  ;;  %v648_v40 = vrot.slane %v643_v38, 6 }
 0x123   :  { %v650_v53 = vsel %vm649_vm12, %v641_v39, %v647_v43 }
 0x124   :  { %v652_v55 = vsel %vm651_vm13, %v650_v53, %v648_v40 }
 0x125   :  { %658 = vst.msk [vmem:[%s1104_s2] sm:$0x7] %vm656_vm14, %v652_v55 }
 0x126   :  { %663 = vsyncpa [#allocation3], 1 }

</bundles_post_ra>
